<compile_context>
chip_gen: v5e
topology: v5e:2x2
jax: 0.10.0
libtpu: 0.0.40
codegen_flags: <defaults>
</compile_context>

<pallas_src>
import functools

import jax
import jax.numpy as jnp
from jax import lax
from jax.experimental import pallas as pl
from jax.experimental.pallas import tpu as pltpu

_HEAD_PAD = 128  # lane width of the fused (policy || value) head output


def _round_up(x, m):
    return (x + m - 1) // m * m


def _cdiv(a, b):
    return -(-a // b)


def _mlp_kernel(x_ref, w1_ref, b1_ref, w2_ref, b2_ref, wh_ref, bh_ref,
                head_ref, feature_ref, *, action_space, layer1_on_vpu):
    mxu_dtype = w2_ref.dtype
    x = x_ref[...]                                                     # [TB, S] f32
    tb, s_dim = x.shape

    # ---- Layer 1: Linear(S, 128) + ReLU -------------------------------------
    if layer1_on_vpu:
        # K = state_space is tiny; MXU push count scales with M, not K, so a
        # dot here wastes a full MXU pass.  S broadcast FMAs on the VPU (f32,
        # v5e-safe) do the same work essentially for free.
        h1 = x[:, 0:1] * w1_ref[0:1, :] + b1_ref[...]                  # [TB, 128]
        for k in range(1, s_dim):
            h1 = h1 + x[:, k:k + 1] * w1_ref[k:k + 1, :]
    else:
        h1 = jnp.dot(x.astype(mxu_dtype), w1_ref[...],
                     preferred_element_type=jnp.float32) + b1_ref[...]
    h1 = jnp.maximum(h1, 0.0)

    # ---- Layer 2: Linear(128, 128) -> "feature" (pre-ReLU), lane-dense store.
    feature = jnp.dot(h1.astype(mxu_dtype), w2_ref[...],
                      preferred_element_type=jnp.float32) + b2_ref[...]
    feature_ref[...] = feature.astype(feature_ref.dtype)               # [TB, 128]

    s = jnp.maximum(feature, 0.0)

    # ---- Fused policy + value head: ONE [TB,128]x[128,128] matmul. ----------
    head = jnp.dot(s.astype(mxu_dtype), wh_ref[...],
                   preferred_element_type=jnp.float32) + bh_ref[...]   # [TB, 128]

    # One-vreg lane index; jnp.where broadcasts it over the [TB, 128] tile.
    col = lax.broadcasted_iota(jnp.int32, (1, _HEAD_PAD), 1)

    # Softmax over the first `action_space` lanes; padded lanes -> -inf -> 0.
    logits = jnp.where(col < action_space, head, -jnp.inf)
    m = jnp.max(logits, axis=-1, keepdims=True)
    e = jnp.exp(logits - m)
    denom = jnp.sum(e, axis=-1, keepdims=True)
    probs = e / denom + 1e-8          # exact division (approx recip failed parity)

    # Lane-dense combined output: probs in lanes [0, A), raw value in lane A.
    out = jnp.where(col == action_space, head, probs)
    head_ref[...] = out.astype(head_ref.dtype)                         # [TB, 128]


def mlp_forward(state, params, *, block_b=1024, mxu_dtype=jnp.bfloat16,
                out_dtype=jnp.float32, min_tiles=2):
    """state: [B, state_space] f32.  Returns (probs, value, feature)."""
    w1, b1, w2, b2, w3, b3, w4, b4 = params
    B, S = state.shape
    H = w2.shape[1]
    A = w3.shape[1]
    assert A + 1 <= _HEAD_PAD, "action_space + 1 must fit in 128 lanes"

    # Fused, lane-padded head weights/bias (b4 folded in).
    wh = jnp.zeros((H, _HEAD_PAD), jnp.float32)
    wh = wh.at[:, :A].set(w3).at[:, A].set(w4[:, 0])
    bh = jnp.zeros((1, _HEAD_PAD), jnp.float32)
    bh = bh.at[:, :A].set(b3).at[:, A].set(b4[0, 0])

    # Layer 1 runs on the VPU (in f32) whenever state_space is tiny.
    layer1_on_vpu = S <= 8
    w1c = w1 if layer1_on_vpu else w1.astype(mxu_dtype)
    w2c = w2.astype(mxu_dtype)
    whc = wh.astype(mxu_dtype)

    # Batch tiling: near-equal 8-aligned tiles, >= min_tiles grid steps when
    # possible (v7x 2-TC sharding), tile capped at block_b, minimal pad waste.
    n_tiles = max(1, _cdiv(B, block_b))
    if n_tiles < min_tiles and B >= 8 * min_tiles:
        n_tiles = min_tiles
    TB = _round_up(_cdiv(B, n_tiles), 8)
    Bp = TB * n_tiles
    if Bp != B:
        state = jnp.pad(state, ((0, Bp - B), (0, 0)))
    grid = (n_tiles,)

    dsize = lambda a: a.size * a.dtype.itemsize
    out_item = jnp.dtype(out_dtype).itemsize
    weight_bytes = sum(dsize(a) for a in (w1c, b1, w2c, b2, whc, bh))
    in_bytes = Bp * S * 4 + weight_bytes
    out_bytes = Bp * (_HEAD_PAD + H) * out_item
    cost = pl.CostEstimate(
        flops=2 * Bp * (S * H + H * H + H * _HEAD_PAD),
        transcendentals=Bp * _HEAD_PAD,
        bytes_accessed=in_bytes + out_bytes,
    )

    # Tight VMEM budget: double-buffered state tile + output slabs + weights.
    tile_bytes = TB * (S * 4 + (_HEAD_PAD + H) * out_item)
    vmem_limit = int(min(64 << 20, max(4 << 20,
                                       2 * (2 * tile_bytes + weight_bytes) + (2 << 20))))

    const = lambda i: (0, 0)   # weights/biases stay VMEM-resident across the grid
    head_out, feature_out = pl.pallas_call(
        functools.partial(_mlp_kernel, action_space=A,
                          layer1_on_vpu=layer1_on_vpu),
        grid=grid,
        out_shape=(
            jax.ShapeDtypeStruct((Bp, _HEAD_PAD), out_dtype),  # probs|value slab
            jax.ShapeDtypeStruct((Bp, H), out_dtype),          # feature
        ),
        in_specs=[
            pl.BlockSpec((TB, S), lambda i: (i, 0)),            # state tile
            pl.BlockSpec((S, H), const),                        # w1
            pl.BlockSpec((1, H), const),                        # b1
            pl.BlockSpec((H, H), const),                        # w2
            pl.BlockSpec((1, H), const),                        # b2
            pl.BlockSpec((H, _HEAD_PAD), const),                # fused head W
            pl.BlockSpec((1, _HEAD_PAD), const),                # fused head b
        ],
        out_specs=(
            pl.BlockSpec((TB, _HEAD_PAD), lambda i: (i, 0)),
            pl.BlockSpec((TB, H), lambda i: (i, 0)),
        ),
        compiler_params=pltpu.CompilerParams(
            dimension_semantics=("parallel",),   # megacore / v7x 2-TC sharding
            vmem_limit_bytes=vmem_limit,
        ),
        cost_estimate=cost,
    )(state, w1c, b1, w2c, b2, whc, bh)

    probs = head_out[:B, :A]
    value = head_out[:B, A:A + 1]
    feature = feature_out[:B]
    return probs, value, feature


def init_params(key, state_space, action_space, hidden=128):
    """PyTorch nn.Linear default init: U(-1/sqrt(fan_in), 1/sqrt(fan_in)).
    Weights stored [in, out]; biases stored [1, out]."""
    def linear(k, fan_in, fan_out):
        kw, kb = jax.random.split(k)
        bound = 1.0 / jnp.sqrt(float(fan_in))
        w = jax.random.uniform(kw, (fan_in, fan_out), jnp.float32, -bound, bound)
        b = jax.random.uniform(kb, (1, fan_out), jnp.float32, -bound, bound)
        return w, b

    k1, k2, k3, k4 = jax.random.split(key, 4)
    w1, b1 = linear(k1, state_space, hidden)
    w2, b2 = linear(k2, hidden, hidden)
    w3, b3 = linear(k3, hidden, action_space)
    w4, b4 = linear(k4, hidden, 1)
    return (w1, b1, w2, b2, w3, b3, w4, b4)


if __name__ == "__main__":
    # Classic-control-like sizes: CartPole has state_space=4, action_space=2.
    B, STATE_SPACE, ACTION_SPACE = 8, 4, 2

    key = jax.random.PRNGKey(0)
    k_params, k_state = jax.random.split(key)
    params = init_params(k_params, STATE_SPACE, ACTION_SPACE)
    state = jax.random.normal(k_state, (B, STATE_SPACE), jnp.float32)

    # Pure-JAX reference.
    w1, b1, w2, b2, w3, b3, w4, b4 = params
    h1 = jnp.maximum(state @ w1 + b1, 0.0)
    feat_ref = h1 @ w2 + b2
    s = jnp.maximum(feat_ref, 0.0)
    logits = s @ w3 + b3
    probs_ref = jax.nn.softmax(logits, axis=-1) + 1e-8
    value_ref = s @ w4 + b4

    # Default path: bf16 MXU inputs (v6e/v7x performance path), f32 accum.
    probs, value, feature = mlp_forward(state, params)
    jax.block_until_ready((probs, value, feature))
    assert probs.shape == (B, ACTION_SPACE)
    assert value.shape == (B, 1)
    assert feature.shape == (B, 128)
    assert jnp.allclose(feature, feat_ref, atol=5e-2, rtol=5e-2), "feature mismatch (bf16)"
    assert jnp.allclose(value, value_ref, atol=5e-2, rtol=5e-2), "value mismatch (bf16)"
    assert jnp.allclose(probs, probs_ref, atol=5e-2), "probs mismatch (bf16)"

    # Exact f32 MXU path — strict parity with the reference (exact softmax div).
    probs32, value32, feat32 = mlp_forward(state, params, mxu_dtype=jnp.float32)
    jax.block_until_ready((probs32, value32, feat32))
    assert jnp.allclose(feat32, feat_ref, atol=1e-5), "feature mismatch (f32)"
    assert jnp.allclose(value32, value_ref, atol=1e-5), "value mismatch (f32)"
    assert jnp.allclose(probs32, probs_ref, atol=1e-5), "probs mismatch (f32)"

    print("KERNEL_OK")
</pallas_src>

<mosaic_0001>
module attributes {stable_mosaic.version = 11 : i64} {
  func.func @_mlp_kernel(%arg0: i32, %arg1: memref<8x4xf32, #tpu.memory_space<vmem>>, %arg2: memref<4x128xf32, #tpu.memory_space<vmem>>, %arg3: memref<1x128xf32, #tpu.memory_space<vmem>>, %arg4: memref<128x128xbf16, #tpu.memory_space<vmem>>, %arg5: memref<1x128xf32, #tpu.memory_space<vmem>>, %arg6: memref<128x128xbf16, #tpu.memory_space<vmem>>, %arg7: memref<1x128xf32, #tpu.memory_space<vmem>>, %arg8: memref<8x128xf32, #tpu.memory_space<vmem>>, %arg9: memref<8x128xf32, #tpu.memory_space<vmem>>) attributes {dimension_semantics = [#tpu.dimension_semantics<parallel>], iteration_bounds = array<i64: 1>, scalar_prefetch = 0 : i64, scratch_operands = 0 : i64, tpu.core_type = #tpu.core_type<tc>, window_params = [{transform_indices = @transform_0, window_bounds = array<i64: 8, 4>}, {pipeline_mode = #tpu.pipeline_mode<synchronous>, transform_indices = @transform_1, window_bounds = array<i64: 4, 128>}, {pipeline_mode = #tpu.pipeline_mode<synchronous>, transform_indices = @transform_2, window_bounds = array<i64: 1, 128>}, {pipeline_mode = #tpu.pipeline_mode<synchronous>, transform_indices = @transform_3, window_bounds = array<i64: 128, 128>}, {pipeline_mode = #tpu.pipeline_mode<synchronous>, transform_indices = @transform_4, window_bounds = array<i64: 1, 128>}, {pipeline_mode = #tpu.pipeline_mode<synchronous>, transform_indices = @transform_5, window_bounds = array<i64: 128, 128>}, {pipeline_mode = #tpu.pipeline_mode<synchronous>, transform_indices = @transform_6, window_bounds = array<i64: 1, 128>}, {transform_indices = @transform_7, window_bounds = array<i64: 8, 128>}, {transform_indices = @transform_8, window_bounds = array<i64: 8, 128>}]} {
    %c0 = arith.constant 0 : index
    %c0_0 = arith.constant 0 : index
    %0 = vector.load %arg1[%c0, %c0_0] : memref<8x4xf32, #tpu.memory_space<vmem>>, vector<8x4xf32>
    %1 = vector.extract_strided_slice %0 {offsets = [0, 0], sizes = [8, 1], strides = [1, 1]} : vector<8x4xf32> to vector<8x1xf32>
    %c0_1 = arith.constant 0 : index
    %c0_2 = arith.constant 0 : index
    %2 = vector.load %arg2[%c0_1, %c0_2] : memref<4x128xf32, #tpu.memory_space<vmem>>, vector<1x128xf32>
    %3 = vector.broadcast %1 : vector<8x1xf32> to vector<8x128xf32>
    %4 = vector.broadcast %2 : vector<1x128xf32> to vector<8x128xf32>
    %5 = arith.mulf %3, %4 : vector<8x128xf32>
    %c0_3 = arith.constant 0 : index
    %c0_4 = arith.constant 0 : index
    %6 = vector.load %arg3[%c0_3, %c0_4] : memref<1x128xf32, #tpu.memory_space<vmem>>, vector<1x128xf32>
    %7 = vector.broadcast %6 : vector<1x128xf32> to vector<8x128xf32>
    %8 = arith.addf %5, %7 : vector<8x128xf32>
    %9 = vector.extract_strided_slice %0 {offsets = [0, 1], sizes = [8, 1], strides = [1, 1]} : vector<8x4xf32> to vector<8x1xf32>
    %c1 = arith.constant 1 : index
    %c0_5 = arith.constant 0 : index
    %10 = vector.load %arg2[%c1, %c0_5] : memref<4x128xf32, #tpu.memory_space<vmem>>, vector<1x128xf32>
    %11 = vector.broadcast %9 : vector<8x1xf32> to vector<8x128xf32>
    %12 = vector.broadcast %10 : vector<1x128xf32> to vector<8x128xf32>
    %13 = arith.mulf %11, %12 : vector<8x128xf32>
    %14 = arith.addf %8, %13 : vector<8x128xf32>
    %15 = vector.extract_strided_slice %0 {offsets = [0, 2], sizes = [8, 1], strides = [1, 1]} : vector<8x4xf32> to vector<8x1xf32>
    %c2 = arith.constant 2 : index
    %c0_6 = arith.constant 0 : index
    %16 = vector.load %arg2[%c2, %c0_6] : memref<4x128xf32, #tpu.memory_space<vmem>>, vector<1x128xf32>
    %17 = vector.broadcast %15 : vector<8x1xf32> to vector<8x128xf32>
    %18 = vector.broadcast %16 : vector<1x128xf32> to vector<8x128xf32>
    %19 = arith.mulf %17, %18 : vector<8x128xf32>
    %20 = arith.addf %14, %19 : vector<8x128xf32>
    %21 = vector.extract_strided_slice %0 {offsets = [0, 3], sizes = [8, 1], strides = [1, 1]} : vector<8x4xf32> to vector<8x1xf32>
    %c3 = arith.constant 3 : index
    %c0_7 = arith.constant 0 : index
    %22 = vector.load %arg2[%c3, %c0_7] : memref<4x128xf32, #tpu.memory_space<vmem>>, vector<1x128xf32>
    %23 = vector.broadcast %21 : vector<8x1xf32> to vector<8x128xf32>
    %24 = vector.broadcast %22 : vector<1x128xf32> to vector<8x128xf32>
    %25 = arith.mulf %23, %24 : vector<8x128xf32>
    %26 = arith.addf %20, %25 : vector<8x128xf32>
    %cst = arith.constant 0.000000e+00 : f32
    %27 = vector.broadcast %cst : f32 to vector<8x128xf32>
    %28 = arith.maximumf %26, %27 : vector<8x128xf32>
    %29 = arith.truncf %28 : vector<8x128xf32> to vector<8x128xbf16>
    %c0_8 = arith.constant 0 : index
    %c0_9 = arith.constant 0 : index
    %30 = vector.load %arg4[%c0_8, %c0_9] : memref<128x128xbf16, #tpu.memory_space<vmem>>, vector<128x128xbf16>
    %cst_10 = arith.constant dense<0.000000e+00> : vector<8x128xf32>
    %31 = tpu.matmul %29, %30, %cst_10 {dimension_numbers = #tpu.dot_dimension_numbers<[1], [0], [0], [1], [0, 0, 1, 1], [], []>} : vector<8x128xbf16>, vector<128x128xbf16>, vector<8x128xf32> -> vector<8x128xf32>
    %c0_11 = arith.constant 0 : index
    %c0_12 = arith.constant 0 : index
    %32 = vector.load %arg5[%c0_11, %c0_12] : memref<1x128xf32, #tpu.memory_space<vmem>>, vector<1x128xf32>
    %33 = vector.broadcast %32 : vector<1x128xf32> to vector<8x128xf32>
    %34 = arith.addf %31, %33 : vector<8x128xf32>
    %c0_13 = arith.constant 0 : index
    %c0_14 = arith.constant 0 : index
    %35 = vector.load %arg9[%c0_13, %c0_14] : memref<8x128xf32, #tpu.memory_space<vmem>>, vector<8x128xf32>
    tpu.vector_store %arg9[%c0_13, %c0_14], %34 {strides = array<i32>} : memref<8x128xf32, #tpu.memory_space<vmem>>, vector<8x128xf32>,
    %cst_15 = arith.constant 0.000000e+00 : f32
    %36 = vector.broadcast %cst_15 : f32 to vector<8x128xf32>
    %37 = arith.maximumf %34, %36 : vector<8x128xf32>
    %38 = arith.truncf %37 : vector<8x128xf32> to vector<8x128xbf16>
    %c0_16 = arith.constant 0 : index
    %c0_17 = arith.constant 0 : index
    %39 = vector.load %arg6[%c0_16, %c0_17] : memref<128x128xbf16, #tpu.memory_space<vmem>>, vector<128x128xbf16>
    %cst_18 = arith.constant dense<0.000000e+00> : vector<8x128xf32>
    %40 = tpu.matmul %38, %39, %cst_18 {dimension_numbers = #tpu.dot_dimension_numbers<[1], [0], [0], [1], [0, 0, 1, 1], [], []>} : vector<8x128xbf16>, vector<128x128xbf16>, vector<8x128xf32> -> vector<8x128xf32>
    %c0_19 = arith.constant 0 : index
    %c0_20 = arith.constant 0 : index
    %41 = vector.load %arg7[%c0_19, %c0_20] : memref<1x128xf32, #tpu.memory_space<vmem>>, vector<1x128xf32>
    %42 = vector.broadcast %41 : vector<1x128xf32> to vector<8x128xf32>
    %43 = arith.addf %40, %42 : vector<8x128xf32>
    %44 = tpu.iota {dimensions = array<i32: 1>} : vector<1x128xi32>
    %c2_i32 = arith.constant 2 : i32
    %45 = vector.broadcast %c2_i32 : i32 to vector<1x128xi32>
    %46 = arith.cmpi slt, %44, %45 : vector<1x128xi32>
    %cst_21 = arith.constant 0xFF800000 : f32
    %47 = vector.shape_cast %46 : vector<1x128xi1> to vector<1x128xi1>
    %48 = vector.broadcast %47 : vector<1x128xi1> to vector<8x128xi1>
    %49 = vector.broadcast %cst_21 : f32 to vector<8x128xf32>
    %50 = arith.select %48, %43, %49 : vector<8x128xi1>, vector<8x128xf32>
    %cst_22 = arith.constant dense<0xFF800000> : vector<8xf32>
    %51 = vector.multi_reduction <maximumf>, %50, %cst_22 [1] : vector<8x128xf32> to vector<8xf32>
    %52 = vector.shape_cast %51 : vector<8xf32> to vector<8x1xf32>
    %53 = vector.broadcast %52 : vector<8x1xf32> to vector<8x128xf32>
    %54 = arith.subf %50, %53 : vector<8x128xf32>
    %55 = math.exp %54 : vector<8x128xf32>
    %cst_23 = arith.constant dense<0.000000e+00> : vector<8xf32>
    %56 = vector.multi_reduction <add>, %55, %cst_23 [1] : vector<8x128xf32> to vector<8xf32>
    %57 = vector.shape_cast %56 : vector<8xf32> to vector<8x1xf32>
    %58 = vector.broadcast %57 : vector<8x1xf32> to vector<8x128xf32>
    %59 = arith.divf %55, %58 : vector<8x128xf32>
    %cst_24 = arith.constant 9.99999993E-9 : f32
    %60 = vector.broadcast %cst_24 : f32 to vector<8x128xf32>
    %61 = arith.addf %59, %60 : vector<8x128xf32>
    %c2_i32_25 = arith.constant 2 : i32
    %62 = vector.broadcast %c2_i32_25 : i32 to vector<1x128xi32>
    %63 = arith.cmpi eq, %44, %62 : vector<1x128xi32>
    %64 = vector.shape_cast %63 : vector<1x128xi1> to vector<1x128xi1>
    %65 = vector.broadcast %64 : vector<1x128xi1> to vector<8x128xi1>
    %66 = arith.select %65, %43, %61 : vector<8x128xi1>, vector<8x128xf32>
    %c0_26 = arith.constant 0 : index
    %c0_27 = arith.constant 0 : index
    %67 = vector.load %arg8[%c0_26, %c0_27] : memref<8x128xf32, #tpu.memory_space<vmem>>, vector<8x128xf32>
    tpu.vector_store %arg8[%c0_26, %c0_27], %66 {strides = array<i32>} : memref<8x128xf32, #tpu.memory_space<vmem>>, vector<8x128xf32>,
    return
  }
  func.func @transform_0(%arg0: i32) -> (i32, i32) {
    %c0_i32 = arith.constant 0 : i32
    %c0_i32_0 = arith.constant 0 : i32
    return %arg0, %c0_i32 : i32, i32
  }
  func.func @transform_1(%arg0: i32) -> (i32, i32) {
    %c0_i32 = arith.constant 0 : i32
    %c0_i32_0 = arith.constant 0 : i32
    %c0_i32_1 = arith.constant 0 : i32
    return %c0_i32, %c0_i32_0 : i32, i32
  }
  func.func @transform_2(%arg0: i32) -> (i32, i32) {
    %c0_i32 = arith.constant 0 : i32
    %c0_i32_0 = arith.constant 0 : i32
    %c0_i32_1 = arith.constant 0 : i32
    return %c0_i32, %c0_i32_0 : i32, i32
  }
  func.func @transform_3(%arg0: i32) -> (i32, i32) {
    %c0_i32 = arith.constant 0 : i32
    %c0_i32_0 = arith.constant 0 : i32
    %c0_i32_1 = arith.constant 0 : i32
    return %c0_i32, %c0_i32_0 : i32, i32
  }
  func.func @transform_4(%arg0: i32) -> (i32, i32) {
    %c0_i32 = arith.constant 0 : i32
    %c0_i32_0 = arith.constant 0 : i32
    %c0_i32_1 = arith.constant 0 : i32
    return %c0_i32, %c0_i32_0 : i32, i32
  }
  func.func @transform_5(%arg0: i32) -> (i32, i32) {
    %c0_i32 = arith.constant 0 : i32
    %c0_i32_0 = arith.constant 0 : i32
    %c0_i32_1 = arith.constant 0 : i32
    return %c0_i32, %c0_i32_0 : i32, i32
  }
  func.func @transform_6(%arg0: i32) -> (i32, i32) {
    %c0_i32 = arith.constant 0 : i32
    %c0_i32_0 = arith.constant 0 : i32
    %c0_i32_1 = arith.constant 0 : i32
    return %c0_i32, %c0_i32_0 : i32, i32
  }
  func.func @transform_7(%arg0: i32) -> (i32, i32) {
    %c0_i32 = arith.constant 0 : i32
    %c0_i32_0 = arith.constant 0 : i32
    return %arg0, %c0_i32 : i32, i32
  }
  func.func @transform_8(%arg0: i32) -> (i32, i32) {
    %c0_i32 = arith.constant 0 : i32
    %c0_i32_0 = arith.constant 0 : i32
    return %arg0, %c0_i32 : i32, i32
  }
}

</mosaic_0001>

<bundles_post_ra>
// kernel: tpu_custom_call.1
= control target key start
LH: loop header
LB: loop body
LE: loop exit
PB: predicated region body
PF: predicated region fallthrough
CT: control target
= control target key end

     0   :  { %14 = vsyncpa [#allocation3], 0  ;;  %s636_s0 = inlined_call_operand.vmem [shape: f32[8,4], index: 0, kind: input, shape index: {}]   ;;  %s637_s1 = inlined_call_operand.vmem [shape: f32[4,128], index: 1, kind: input, shape index: {}]   ;;  %s638_s2 = inlined_call_operand.vmem [shape: f32[1,128], index: 2, kind: input, shape index: {}]   ;;  %s639_s3 = inlined_call_operand.hbm [shape: bf16[128,128], index: 3, kind: input, shape index: {}]   ;;  %s640_s4 = inlined_call_operand.vmem [shape: f32[1,128], index: 4, kind: input, shape index: {}]   ;;  %s641_s5 = inlined_call_operand.hbm [shape: bf16[128,128], index: 5, kind: input, shape index: {}]   ;;  %s642_s6 = inlined_call_operand.vmem [shape: f32[1,128], index: 6, kind: input, shape index: {}]   ;;  %s643_s7 = inlined_call_operand.hbm [shape: f32[8,128], index: 7, kind: output, shape index: {0}]   ;;  %s644_s8 = inlined_call_operand.hbm [shape: f32[8,128], index: 8, kind: output, shape index: {1}]  }
   0x1   :  { %15 = vsyncpa [#allocation6], 0 }
   0x2   :  { %16 = vsyncpa [#allocation4], 0 }
   0x3   :  { %17 = vsyncpa [#allocation9], 0  ;;  %s28_s29 = sshll.u32 %s639_s3, 4  ;;  %s545_s30 = smov [#allocation2]   ;;  %s29_s29 = int_to_ptr.hbm [resolvable:$true] %s28_s29 }
   0x4   :  { %s30_s9 = sshll.u32 %s545_s30, 4  ;;  %s43_s12 = sshll.u32 %s641_s5, 4  ;;  %s31_s9 = int_to_ptr.vmem [resolvable:$true] %s30_s9  ;;  %s44_s12 = int_to_ptr.hbm [resolvable:$true] %s43_s12 }
   0x5   :  { %s546_s13 = smov 64   ;;  %s547_s14 = smov 4  }
   0x6   :  { %36 = dma.hbm_to_vmem [thread:$0]  %s29_s29, 1024, %s31_s9, [#allocation3], %s546_s13, %s546_s13, %s547_s14  }
   0x7   :  { %s548_s15 = smov [#allocation5]  }
   0x8   :  { %s45_s16 = sshll.u32 %s548_s15, 4  ;;  %s46_s16 = int_to_ptr.vmem [resolvable:$true] %s45_s16 }
   0x9   :  { %51 = dma.hbm_to_vmem [thread:$0]  %s44_s12, 1024, %s46_s16, [#allocation6], %s546_s13, %s546_s13, %s547_s14  }
   0xa   :  { %537 = dma.done.wait [#allocation3], 1024  }
   0xb   :  { %538 = vsyncadd [#allocation3], 4294966272 }
   0xc   :  { %539 = dma.done.wait [#allocation6], 1024  }
   0xd   :  { %540 = vsyncadd [#allocation6], 4294966272  ;;  %v549_v0 = vmov 0   ;;  %v550_v1 = vmov 2   ;;  %v62_v2 = vld [vmem:[%s636_s0] sm:$0xff]  ;;  %v406_v3 = vld [vmem:[#allocation2 + $0x38] sm:$0xff]  ;;  %v267_v46 = vlaneseq }
   0xe   :  { %425 = vset.pattern.permute.xlu0 %v549_v0  ;;  %427 = vset.pattern.permute.xlu1 %v550_v1  ;;  %v405_v4 = vld [vmem:[#allocation2 + $0x30] sm:$0xff]  ;;  %v404_v5 = vld [vmem:[#allocation2 + $0x28] sm:$0xff]  ;;  %v551_v6 = vmov 1   ;;  %v552_v7 = vmov 3   ;;  %v403_v8 = vld [vmem:[#allocation2 + $0x20] sm:$0xff]  ;;  %s319_s9 = sshll.u32 %s644_s8, 4  ;;  %s320_s9 = int_to_ptr.hbm [resolvable:$true] %s319_s9 }
   0xf   :  { %66 = vperm.xlu0 %425, %v62_v2   ;;  %86 = vperm.xlu1 %427, %v62_v2   ;;  %v402_v9 = vld [vmem:[#allocation2 + $0x18] sm:$0xff]  ;;  %v401_v10 = vld [vmem:[#allocation2 + $0x10] sm:$0xff]  ;;  %v400_v11 = vld [vmem:[#allocation2 + $0x8] sm:$0xff]  ;;  %v268_v47 = vand.u32 127, %v267_v46  ;;  %s308_s12 = sshll.u32 %s643_s7, 4  ;;  %s309_s12 = int_to_ptr.hbm [resolvable:$true] %s308_s12 }
  0x10   :  { %170 = vmatpush.bf16.msra.mxu0 %v406_v3  ;;  %v399_v12 = vld [vmem:[#allocation2] sm:$0xff]  ;;  %v414_v13 = vld [vmem:[#allocation5 + $0x38] sm:$0xff]  ;;  %v413_v14 = vld [vmem:[#allocation5 + $0x30] sm:$0xff] }
  0x11   :  { %254 = vmatpush.bf16.msra.mxu1 %v414_v13  ;;  %v412_v15 = vld [vmem:[#allocation5 + $0x28] sm:$0xff]  ;;  %v411_v18 = vld [vmem:[#allocation5 + $0x20] sm:$0xff]  ;;  %v410_v20 = vld [vmem:[#allocation5 + $0x18] sm:$0xff]  ;;  %vm269_vm0 = vcmp.lt.s32.totalorder %v268_v47, 2  ;;  %vm296_vm5 = vcmp.eq.s32.totalorder %v268_v47, 2 }
  0x12   :  { %v430_v19 = vld [vmem:[%s637_s1] ss:$0 sm:$0xff]  ;;  %v433_v23 = vld [vmem:[%s637_s1 + $0x1] ss:$0 sm:$0xff]  ;;  %v432_v24 = vld [vmem:[%s637_s1 + $0x2] ss:$0 sm:$0xff] }
  0x13   :  { %v431_v21 = vld [vmem:[%s638_s2] ss:$0 sm:$0xff]  ;;  %v434_v25 = vld [vmem:[%s637_s1 + $0x3] ss:$0 sm:$0xff]  ;;  %v409_v26 = vld [vmem:[#allocation5 + $0x10] sm:$0xff] }
  0x14   :  { %171 = vmatpush.bf16.msra.mxu0 %v405_v4  ;;  %v408_v38 = vld [vmem:[#allocation5 + $0x8] sm:$0xff]  ;;  %v407_v39 = vld [vmem:[#allocation5] sm:$0xff] }
  0x15   :  { %255 = vmatpush.bf16.msra.mxu1 %v413_v14  ;;  %v435_v40 = vld [vmem:[%s640_s4] ss:$0 sm:$0xff]  ;;  %s553_s4 = smov [#allocation8]  }
  0x16   :  { %v436_v48 = vld [vmem:[%s642_s6] ss:$0 sm:$0xff]  ;;  %s317_s28 = sshll.u32 %s553_s4, 4  ;;  %s554_s6 = smov [#allocation7]   ;;  %s318_s28 = int_to_ptr.vmem [resolvable:$true] %s317_s28 }
  0x17   :  { %426 = vset.pattern.permute.xlu0 %v551_v6  ;;  %428 = vset.pattern.permute.xlu1 %v552_v7  ;;  %s306_s8 = sshll.u32 %s554_s6, 4  ;;  %s307_s8 = int_to_ptr.vmem [resolvable:$true] %s306_s8 }
  0x18   :  { %78 = vperm.xlu0 %426, %v62_v2   ;;  %94 = vperm.xlu1 %428, %v62_v2  }
  0x19   :  { %172 = vmatpush.bf16.msra.mxu0 %v404_v5  ;;  %256 = vmatpush.bf16.msra.mxu1 %v412_v15 }
  0x1d   :  { %173 = vmatpush.bf16.msra.mxu0 %v403_v8  ;;  %257 = vmatpush.bf16.msra.mxu1 %v411_v18 }
  0x20   :  { %429 = vset.pattern.permute.xlu0 %v552_v7 }
  0x21   :  { %174 = vmatpush.bf16.msra.mxu0 %v402_v9  ;;  %258 = vmatpush.bf16.msra.mxu1 %v410_v20 }
  0x25   :  { %175 = vmatpush.bf16.msra.mxu0 %v401_v10  ;;  %259 = vmatpush.bf16.msra.mxu1 %v409_v26 }
  0x29   :  { %176 = vmatpush.bf16.msra.mxu0 %v400_v11  ;;  %260 = vmatpush.bf16.msra.mxu1 %v408_v38 }
  0x2d   :  { %177 = vmatpush.bf16.msra.mxu0 %v399_v12  ;;  %261 = vmatpush.bf16.msra.mxu1 %v407_v39 }
  0x81   :  { %v67_v16 = vpop.permute.xlu0 %66  ;;  %v87_v17 = vpop.permute.xlu1 %86 }
  0x82   :  { %v70_v22 = vmul.f32 %v430_v19, %v67_v16  ;;  %v90_v31 = vmul.f32 %v432_v24, %v87_v17 }
  0x84   :  { %v75_v29 = vadd.f32 %v431_v21, %v70_v22 }
  0x8a   :  { %v79_v27 = vpop.permute.xlu0 %78  ;;  %v95_v28 = vpop.permute.xlu1 %94 }
  0x8b   :  { %v82_v30 = vmul.f32 %v433_v23, %v79_v27  ;;  %v98_v33 = vmul.f32 %v434_v25, %v95_v28 }
  0x8d   :  { %v83_v32 = vadd.f32 %v82_v30, %v75_v29 }
  0x8f   :  { %v91_v34 = vadd.f32 %v90_v31, %v83_v32 }
  0x91   :  { %v99_v35 = vadd.f32 %v98_v33, %v91_v34 }
  0x93   :  { %v100_v36 = vmax.f32 %v99_v35, 0.0 }
  0x95   :  { %v101_v37 = vpack.c.bf16 %v100_v36, %v100_v36 }
  0x97   :  { %178 = vmatmul.bf16.vlgmr.msra.gmra.mxu0 %v101_v37 }
 0x114   :  { %v179_v41 = vpop.f32.mrf.mxu0 }
 0x115   :  { %v180_v42 = vadd.f32 %v435_v40, %v179_v41 }
 0x117   :  { %183 = vst [vmem:[#allocation8] sm:$0xff] %v180_v42  ;;  %v184_v43 = vmax.f32 %v180_v42, 0.0 }
 0x118   :  { %322 = dma.vmem_to_hbm [thread:$0]  %s318_s28, 128, %s320_s9, [#allocation9]  }
 0x119   :  { %v185_v44 = vpack.c.bf16 %v184_v43, %v184_v43 }
 0x11b   :  { %262 = vmatmul.bf16.vlgmr.msra.gmra.mxu1 %v185_v44 }
 0x11c   :  { %v181_v45 = vpop.f32.mrf.mxu0 }
 0x198   :  { %v263_v49 = vpop.f32.mrf.mxu1 }
 0x199   :  { %v264_v50 = vadd.f32 %v436_v48, %v263_v49 }
 0x19b   :  { %v272_v51 = vsel %vm269_vm0, %v264_v50, -inf }
 0x19c   :  { %273 = vmax.xlane.f32.xlu2 %v272_v51 }
 0x1a0   :  { %v265_v52 = vpop.f32.mrf.mxu1 }
 0x20f   :  { %v274_v53 = vpop.xlane.xlu2 %273 }
 0x210   :  { %v275_v54 = vsub.f32 %v272_v51, %v274_v53 }
 0x212   :  { %v276_v55 = vmul.f32 1.442695, %v275_v54 }
 0x214   :  { %437 = vpow2.f32 %v276_v55 }
 0x21a   :  { %v438_v56 = vpop.eup %437 }
 0x21b   :  { %278 = vadd.xlane.f32.xlu2 %v438_v56 }
 0x28e   :  { %v279_v57 = vpop.xlane.xlu2 %278 }
 0x28f   :  { %439 = vrcp.f32 %v279_v57  ;;  %v291_v61 = vand.u32 2147483648, %v279_v57  ;;  %v289_v63 = vand.u32 2147483647, %v279_v57  ;;  %vm285_vm2 = vweird.f32 %v279_v57 }
 0x291   :  { %v292_v1 = vor.u32 1.1754944e-38, %v291_v61  ;;  %vm290_vm4 = vcmp.eq.f32.partialorder %v289_v63, 8.507059e+37 }
 0x295   :  { %v440_v58 = vpop.eup %439 }
 0x296   :  { %v281_v59 = vmul.f32 %v440_v58, %v279_v57  ;;  %vm286_vm1 = vweird.f32 %v440_v58 }
 0x297   :  { %vm287_vm3 = vmor %vm285_vm2, %vm286_vm1 }
 0x298   :  { %v282_v60 = vsub.f32 1.0, %v281_v59 }
 0x29a   :  { %v283_v62 = vmul.f32 %v440_v58, %v282_v60 }
 0x29c   :  { %v284_v0 = vadd.f32 %v440_v58, %v283_v62 }
 0x29e   :  { %v288_v2 = vsel %vm287_vm3, %v440_v58, %v284_v0 }
 0x29f   :  { %v293_v3 = vsel %vm290_vm4, %v292_v1, %v288_v2 }
 0x2a0   :  { %v294_v4 = vmul.f32 %v438_v56, %v293_v3 }
 0x2a2   :  { %v295_v5 = vadd.f32 1e-08, %v294_v4 }
 0x2a4   :  { %v299_v6 = vsel %vm296_vm5, %v264_v50, %v295_v5 }
 0x2a5   :  { %300 = vst [vmem:[#allocation7] sm:$0xff] %v299_v6 }
 0x2a6   :  { %311 = dma.vmem_to_hbm [thread:$0]  %s307_s8, 128, %s309_s12, [#allocation4]  }
 0x2a7   :  { %541 = dma.done.wait [#allocation4], 128  }
 0x2a8   :  { %542 = vsyncadd [#allocation4], 4294967168 }
 0x2a9   :  { %543 = dma.done.wait [#allocation9], 128  }
 0x2aa   :  { %544 = vsyncadd [#allocation9], 4294967168 }
 0x2ab   :  { %331 = vsyncpa [#allocation3], 1 }
 0x2ac   :  { %332 = vsyncpa [#allocation6], 1 }
 0x2ad   :  { %333 = vsyncpa [#allocation4], 1 }
 0x2ae   :  { %334 = vsyncpa [#allocation9], 1 }

</bundles_post_ra>
